<compile_context>
chip_gen: v6e
topology: v6e:2x2x1
jax: 0.10.0
libtpu: 0.0.40
codegen_flags: <defaults>
</compile_context>

<pallas_src>
import functools

import jax
import jax.numpy as jnp
from jax.experimental import pallas as pl
from jax.experimental.pallas import tpu as pltpu


_LANE = 128


def _tanh200_kernel(x_ref, o_ref, *, compute_dtype):
    # tanh runs on the EUP; the *1/200 scale co-issues on the VPU (free slot).
    x = x_ref[...].astype(compute_dtype)
    o_ref[...] = jnp.tanh(x * (1.0 / 200.0)).astype(o_ref.dtype)


def _chip_config():
    """Returns (target_block_bytes, vmem_limit_bytes_or_None, force_f32_compute)."""
    try:
        kind = jax.devices()[0].device_kind.lower()
    except Exception:  # pragma: no cover - be conservative if query fails
        kind = ""
    if ("v7" in kind) or ("7x" in kind):
        # v7x: 64 MiB VMEM, 3.2 TB/s HBM -> bigger blocks, raise scoped limit.
        return 8 * 1024 * 1024, 48 << 20, False
    if "v6" in kind:
        # v6e: 32 MiB scoped default -> 4 MiB blocks fit with headroom.
        return 4 * 1024 * 1024, None, False
    if "v5" in kind and ("lite" in kind or "v5e" in kind):
        # v5e: 16 MiB scoped default, no bf16 VPU/EUP -> f32 compute.
        return 2 * 1024 * 1024, None, True
    # Unknown / older chip / interpret: safest settings.
    return 2 * 1024 * 1024, None, True


def _choose_lanes(n):
    # Widest lane-dense last dim that keeps the reshape a copy-free view.
    for lanes in (8 * _LANE, 4 * _LANE, 2 * _LANE, _LANE):
        if n % lanes == 0:
            return lanes
    return _LANE


def tanh200(x):
    """Computes tanh(x / 200) elementwise via a Pallas TPU kernel.

    Preserves shape and dtype (f32 / bf16 expected).
    """
    orig_shape = x.shape
    dtype = x.dtype
    n = x.size
    if n == 0:
        return x

    target_bytes, vmem_limit, force_f32 = _chip_config()
    compute_dtype = jnp.float32 if (dtype == jnp.float32 or force_f32) else dtype

    x_flat = x.reshape(-1)

    if n % _LANE == 0:
        lanes = _choose_lanes(n)
        n_aligned = n
        aligned = x_flat
        tail = None
    else:
        lanes = _LANE
        n_aligned = (n // _LANE) * _LANE
        if n_aligned == 0:
            # Tiny ragged tensor: plain jnp is cheaper than any kernel launch.
            y = jnp.tanh(x_flat.astype(compute_dtype) * (1.0 / 200.0))
            return y.astype(dtype).reshape(orig_shape)
        aligned = x_flat[:n_aligned]           # prefix view; no whole-tensor pad
        tail = x_flat[n_aligned:]              # < 128 elements

    rows = n_aligned // lanes
    x2d = aligned.reshape(rows, lanes)

    # Row tile sized to the per-generation block target; multiple of 32
    # sublanes so the (sublane, 128) layout constraint holds for f32/bf16/i8.
    elem_bytes = jnp.dtype(dtype).itemsize
    target_rows = max(32, (target_bytes // (lanes * elem_bytes)) // 32 * 32)
    if rows > target_rows:
        tile_rows = target_rows                 # boundary block masked by Pallas
    elif rows >= 64:
        # Force >= 2 grid steps so both TensorCores contribute on v7x megacore.
        tile_rows = ((pl.cdiv(rows, 2) + 31) // 32) * 32
    else:
        tile_rows = rows                        # full-dim block (legal, tiny tensor)

    grid = (pl.cdiv(rows, tile_rows),)

    kernel = functools.partial(_tanh200_kernel, compute_dtype=compute_dtype)

    out = pl.pallas_call(
        kernel,
        out_shape=jax.ShapeDtypeStruct((rows, lanes), dtype),
        grid_spec=pltpu.PrefetchScalarGridSpec(
            num_scalar_prefetch=0,
            grid=grid,
            in_specs=[pl.BlockSpec((tile_rows, lanes), lambda i: (i, 0))],
            out_specs=pl.BlockSpec((tile_rows, lanes), lambda i: (i, 0)),
        ),
        compiler_params=pltpu.CompilerParams(
            dimension_semantics=("parallel",),   # megacore sharding on v7x
            vmem_limit_bytes=vmem_limit,
        ),
        cost_estimate=pl.CostEstimate(
            flops=n_aligned,
            transcendentals=n_aligned,
            bytes_accessed=2 * n_aligned * elem_bytes,
        ),
    )(x2d)

    if tail is None:
        return out.reshape(orig_shape)

    tail_out = jnp.tanh(tail.astype(compute_dtype) * (1.0 / 200.0)).astype(dtype)
    return jnp.concatenate([out.reshape(-1), tail_out]).reshape(orig_shape)


if __name__ == "__main__":
    key = jax.random.PRNGKey(0)

    # Small NCHW input consistent with typical conv-style usage (n % 128 == 0).
    x = jax.random.normal(key, (2, 4, 16, 16), dtype=jnp.float32) * 100.0
    y = jax.block_until_ready(tanh200(x))
    y_ref = jnp.tanh(x / 200.0)
    assert y.shape == x.shape and y.dtype == x.dtype
    assert jnp.allclose(y, y_ref, atol=1e-6, rtol=1e-6)

    # Ragged size large enough to exercise the aligned-prefix + tail path.
    x2 = jax.random.normal(jax.random.PRNGKey(1), (7, 131), dtype=jnp.float32) * 50.0
    y2 = jax.block_until_ready(tanh200(x2))
    assert y2.shape == x2.shape and y2.dtype == x2.dtype
    assert jnp.allclose(y2, jnp.tanh(x2 / 200.0), atol=1e-6, rtol=1e-6)

    # Tiny ragged size (< 128 elements) exercises the plain-jnp fallback.
    x3 = jax.random.normal(jax.random.PRNGKey(2), (3, 5, 7), dtype=jnp.float32) * 50.0
    y3 = jax.block_until_ready(tanh200(x3))
    assert y3.shape == x3.shape and y3.dtype == x3.dtype
    assert jnp.allclose(y3, jnp.tanh(x3 / 200.0), atol=1e-6, rtol=1e-6)

    print("KERNEL_OK")
</pallas_src>

<mosaic_0001>
module attributes {stable_mosaic.version = 11 : i64} {
  func.func @_tanh200_kernel(%arg0: i32, %arg1: memref<2x1024xf32, #tpu.memory_space<vmem>>, %arg2: memref<2x1024xf32, #tpu.memory_space<vmem>>) attributes {dimension_semantics = [#tpu.dimension_semantics<parallel>], iteration_bounds = array<i64: 1>, scalar_prefetch = 0 : i64, scratch_operands = 0 : i64, tpu.core_type = #tpu.core_type<tc>, window_params = [{transform_indices = @transform_0, window_bounds = array<i64: 2, 1024>}, {transform_indices = @transform_1, window_bounds = array<i64: 2, 1024>}]} {
    %c0 = arith.constant 0 : index
    %c0_0 = arith.constant 0 : index
    %0 = vector.load %arg1[%c0, %c0_0] : memref<2x1024xf32, #tpu.memory_space<vmem>>, vector<2x1024xf32>
    %cst = arith.constant 5.000000e-03 : f32
    %1 = vector.broadcast %cst : f32 to vector<2x1024xf32>
    %2 = arith.mulf %0, %1 : vector<2x1024xf32>
    %3 = math.tanh %2 : vector<2x1024xf32>
    %c0_1 = arith.constant 0 : index
    %c0_2 = arith.constant 0 : index
    %4 = vector.load %arg2[%c0_1, %c0_2] : memref<2x1024xf32, #tpu.memory_space<vmem>>, vector<2x1024xf32>
    tpu.vector_store %arg2[%c0_1, %c0_2], %3 {strides = array<i32>} : memref<2x1024xf32, #tpu.memory_space<vmem>>, vector<2x1024xf32>,
    return
  }
  func.func @transform_0(%arg0: i32) -> (i32, i32) {
    %c0_i32 = arith.constant 0 : i32
    %c0_i32_0 = arith.constant 0 : i32
    return %arg0, %c0_i32 : i32, i32
  }
  func.func @transform_1(%arg0: i32) -> (i32, i32) {
    %c0_i32 = arith.constant 0 : i32
    %c0_i32_0 = arith.constant 0 : i32
    return %arg0, %c0_i32 : i32, i32
  }
}

</mosaic_0001>

<bundles_post_ra>
// kernel: tpu_custom_call.1
= control target key start
LH: loop header
LB: loop body
LE: loop exit
PB: predicated region body
PF: predicated region fallthrough
CT: control target
= control target key end

     0   :  { %6 = vsyncpa [#allocation3], 0  ;;  %s112_s0 = inlined_call_operand.hbm [shape: f32[2,1024], index: 0, kind: input, shape index: {}]   ;;  %s113_s1 = inlined_call_operand.hbm [shape: f32[2,1024], index: 1, kind: output, shape index: {}]  }
   0x1   :  { %7 = vsyncpa [#allocation4], 0  ;;  %s94_s6 = smov [#allocation2]  }
   0x2   :  { %s14_s7 = sshll.u32 %s94_s6, 4  ;;  %s15_s7 = int_to_ptr.vmem [resolvable:$true] %s14_s7 }
   0x3   :  { %s58_s8 = scalar_lea.vmem %s15_s7, 256  ;;  %p63_p1 = scmp.lt.s32.totalorder %s15_s7, %s15_s7 }
   0x4   :  { %p59_p0 = scmp.ne.s32.totalorder %s15_s7, %s58_s8  ;;  %p64_p2 = scmp.lt.s32.totalorder %s58_s8, %s58_s8 }
   0x6   :  { %p65_p3 = por %p64_p2, %p63_p1 }
   0x8   :  { %p66_p4 = pnand %p65_p3, %p59_p0 }
   0xa   :  { %69 = shalt.err (!%p66_p4)
}
   0xb   :  { %17 = dma.hbm_to_vmem [thread:$0]  %s112_s0, 256, %s15_s7, [#allocation3]  }
   0xc   :  { %90 = dma.done.wait [#allocation3], 256  }
   0xd   :  { %91 = vsyncadd [#allocation3], 4294967040  ;;  %v21_v0 = vld [vmem:[#allocation2] sm:$0xff]  ;;  %v22_v1 = vld [vmem:[#allocation2 + $0x8] sm:$0xff]  ;;  %s95_s11 = smov [#allocation5]  }
   0xe   :  { %v23_v2 = vmul.f32 0.005, %v21_v0  ;;  %v24_v3 = vmul.f32 0.005, %v22_v1  ;;  %s35_s12 = sshll.u32 %s95_s11, 4  ;;  %s36_s12 = int_to_ptr.vmem [resolvable:$true] %s35_s12 }
   0xf   :  { %s70_s13 = scalar_lea.vmem %s36_s12, 256  ;;  %p75_p6 = scmp.lt.s32.totalorder %s36_s12, %s36_s12 }
  0x10   :  { %46 = vtanh.f32 %v23_v2  ;;  %p71_p5 = scmp.ne.s32.totalorder %s36_s12, %s70_s13  ;;  %p76_p7 = scmp.lt.s32.totalorder %s70_s13, %s70_s13 }
  0x11   :  { %48 = vtanh.f32 %v24_v3 }
  0x12   :  { %p77_p8 = por %p76_p7, %p75_p6 }
  0x14   :  { %p78_p9 = pnand %p77_p8, %p71_p5 }
  0x1d   :  { %v47_v4 = vpop.eup %46 }
  0x1e   :  { %v49_v5 = vpop.eup %48  ;;  %27 = vst [vmem:[#allocation5] sm:$0xff] %v47_v4 }
  0x1f   :  { %28 = vst [vmem:[#allocation5 + $0x8] sm:$0xff] %v49_v5 }
  0x20   :  { %81 = shalt.err (!%p78_p9)
}
  0x21   :  { %38 = dma.vmem_to_hbm [thread:$0]  %s36_s12, 256, %s113_s1, [#allocation4]  }
  0x22   :  { %92 = dma.done.wait [#allocation4], 256  }
  0x23   :  { %93 = vsyncadd [#allocation4], 4294967040 }
  0x24   :  { %42 = vsyncpa [#allocation3], 1 }
  0x25   :  { %43 = vsyncpa [#allocation4], 1 }

</bundles_post_ra>
